<compile_context>
chip_gen: v6e
topology: v6e:2x2x1
jax: 0.10.0
libtpu: 0.0.40
codegen_flags: <defaults>
</compile_context>

<pallas_src>
import functools

import jax
import jax.numpy as jnp
from jax.experimental import pallas as pl
from jax.experimental.pallas import tpu as pltpu


def _pick_time_chunk(T, max_chunk=32):
    """Chunk length along time that divides T and keeps the block legal on
    the sublane axis (chunk % 8 == 0 or chunk == T)."""
    if T <= max_chunk:
        return T
    for tc in range(max_chunk, 7, -1):
        if tc % 8 == 0 and T % tc == 0:
            return tc
    return T  # fallback: whole sequence in one block


def _lstm_textsubnet_kernel(x_ref, wih_ref, whh_ref, b_ref, wl_ref, bl_ref,
                            y_ref, h_sc, c_sc, *, hidden_size, chunk_len):
    c_idx = pl.program_id(0)
    n_chunks = pl.num_programs(0)
    H = hidden_size
    B = h_sc.shape[0]

    @pl.when(c_idx == 0)
    def _():
        h_sc[...] = jnp.zeros_like(h_sc)
        c_sc[...] = jnp.zeros_like(c_sc)

    # Hoist loop-invariant loads / broadcasts out of the recurrence
    # (JAX does not CSE broadcast_in_dim inside the unrolled loop).
    w_ih = wih_ref[...]                                  # (IN, 4H)
    w_hh = whh_ref[...]                                  # (H, 4H)
    bias = jnp.broadcast_to(b_ref[...], (B, 4 * H))      # (B, 4H), f32
    cdt = w_ih.dtype                                     # MXU operand dtype

    h = h_sc[...]                                        # (B, H) f32 state
    c = c_sc[...]                                        # (B, H) f32 state

    # Fully-unrolled (static) time loop over this chunk: static slices of the
    # x block, no per-step grid/DMA overhead, scheduler sees across steps.
    for t in range(chunk_len):
        x_t = x_ref[:, t, :]                             # (B, IN), static slice
        gates = (jnp.dot(x_t.astype(cdt), w_ih,
                         preferred_element_type=jnp.float32)
                 + jnp.dot(h.astype(cdt), w_hh,
                           preferred_element_type=jnp.float32)
                 + bias)                                  # (B, 4H), f32 acc
        # PyTorch gate order [i, f, g, o].
        i_g = jax.nn.sigmoid(gates[:, 0 * H:1 * H])
        f_g = jax.nn.sigmoid(gates[:, 1 * H:2 * H])
        g_g = jnp.tanh(gates[:, 2 * H:3 * H])
        o_g = jax.nn.sigmoid(gates[:, 3 * H:4 * H])
        c = f_g * c + i_g * g_g
        h = o_g * jnp.tanh(c)

    h_sc[...] = h
    c_sc[...] = c

    # Dropout is identity (num_layers == 1 -> p = 0.0). Fuse the final Linear
    # into the last time chunk.
    @pl.when(c_idx == n_chunks - 1)
    def _():
        y_ref[...] = (jnp.dot(h.astype(wl_ref.dtype), wl_ref[...],
                              preferred_element_type=jnp.float32)
                      + bl_ref[...])


def text_subnet_forward(x, params, *, weights_dtype=jnp.float32, max_chunk=32):
    """x: (batch, seq_len, in_size) float32 -> (batch, out_size) float32.

    weights_dtype=jnp.bfloat16 casts the matmul weights (and the matmul
    operands) to bf16 for MXU-native throughput on v6e/v7x while keeping f32
    accumulation and f32 recurrent state.
    """
    B, T, IN = x.shape
    H = params["w_hh"].shape[1]          # w_hh: (4H, H)
    OUT = params["w_l"].shape[0]         # w_l:  (OUT, H)

    Tc = _pick_time_chunk(T, max_chunk)
    n_chunks = T // Tc

    # Pre-transpose / fold parameters for plain (B, K) @ (K, N) matmuls.
    wih_t = jnp.transpose(params["w_ih"]).astype(weights_dtype)   # (IN, 4H)
    whh_t = jnp.transpose(params["w_hh"]).astype(weights_dtype)   # (H, 4H)
    b = (params["b_ih"] + params["b_hh"]).reshape(1, 4 * H).astype(jnp.float32)
    wl_t = jnp.transpose(params["w_l"]).astype(weights_dtype)     # (H, OUT)
    bl = params["b_l"].reshape(1, OUT).astype(jnp.float32)

    kernel = functools.partial(_lstm_textsubnet_kernel,
                               hidden_size=H, chunk_len=Tc)

    return pl.pallas_call(
        kernel,
        out_shape=jax.ShapeDtypeStruct((B, OUT), jnp.float32),
        grid_spec=pltpu.PrefetchScalarGridSpec(
            num_scalar_prefetch=0,
            grid=(n_chunks,),
            in_specs=[
                # Time-chunk of x in its native (B, T, IN) layout: no
                # wrapper-side transpose / extra HBM pass.
                pl.BlockSpec((B, Tc, IN), lambda c: (0, c, 0)),
                pl.BlockSpec((IN, 4 * H), lambda c: (0, 0)),   # W_ih^T (resident)
                pl.BlockSpec((H, 4 * H), lambda c: (0, 0)),    # W_hh^T (resident)
                pl.BlockSpec((1, 4 * H), lambda c: (0, 0)),    # b_ih + b_hh
                pl.BlockSpec((H, OUT), lambda c: (0, 0)),      # W_linear^T
                pl.BlockSpec((1, OUT), lambda c: (0, 0)),      # b_linear
            ],
            out_specs=pl.BlockSpec((B, OUT), lambda c: (0, 0)),
            scratch_shapes=[
                pltpu.VMEM((B, H), jnp.float32),   # h state (persists across chunks)
                pltpu.VMEM((B, H), jnp.float32),   # c state
            ],
        ),
        compiler_params=pltpu.CompilerParams(
            dimension_semantics=("arbitrary",)),   # sequential recurrence
    )(x, wih_t, whh_t, b, wl_t, bl)


def init_params(key, in_size, hidden_size, out_size):
    """Deterministic synthetic parameters (PyTorch-style uniform init)."""
    ks = jax.random.split(key, 6)
    k_rnn = 1.0 / jnp.sqrt(hidden_size)
    k_lin = 1.0 / jnp.sqrt(hidden_size)
    u = lambda k, shape, bound: jax.random.uniform(
        k, shape, jnp.float32, -bound, bound)
    return {
        "w_ih": u(ks[0], (4 * hidden_size, in_size), k_rnn),
        "w_hh": u(ks[1], (4 * hidden_size, hidden_size), k_rnn),
        "b_ih": u(ks[2], (4 * hidden_size,), k_rnn),
        "b_hh": u(ks[3], (4 * hidden_size,), k_rnn),
        "w_l": u(ks[4], (out_size, hidden_size), k_lin),
        "b_l": u(ks[5], (out_size,), k_lin),
    }


def text_subnet_reference(x, params):
    """Pure-JAX reference matching torch.nn.LSTM + Linear semantics."""
    B, T, IN = x.shape
    H = params["w_hh"].shape[1]
    w_ih_t = params["w_ih"].T
    w_hh_t = params["w_hh"].T
    b = params["b_ih"] + params["b_hh"]

    def step(carry, x_t):
        h, c = carry
        gates = x_t @ w_ih_t + h @ w_hh_t + b
        i = jax.nn.sigmoid(gates[:, 0 * H:1 * H])
        f = jax.nn.sigmoid(gates[:, 1 * H:2 * H])
        g = jnp.tanh(gates[:, 2 * H:3 * H])
        o = jax.nn.sigmoid(gates[:, 3 * H:4 * H])
        c_new = f * c + i * g
        h_new = o * jnp.tanh(c_new)
        return (h_new, c_new), None

    h0 = jnp.zeros((B, H), jnp.float32)
    c0 = jnp.zeros((B, H), jnp.float32)
    (h_T, _), _ = jax.lax.scan(step, (h0, c0), jnp.transpose(x, (1, 0, 2)))
    return h_T @ params["w_l"].T + params["b_l"]


if __name__ == "__main__":
    B, T, IN, H, OUT = 2, 8, 32, 32, 16

    key = jax.random.PRNGKey(0)
    k_x, k_p = jax.random.split(key)
    x = jax.random.normal(k_x, (B, T, IN), jnp.float32)
    params = init_params(k_p, IN, H, OUT)

    y_ref = text_subnet_reference(x, params)

    # Full-precision path: strict correctness check.
    y = text_subnet_forward(x, params)
    y = jax.block_until_ready(y)
    assert y.shape == (B, OUT)
    assert jnp.allclose(y, y_ref, atol=1e-5, rtol=1e-5), (
        f"max abs diff {jnp.max(jnp.abs(y - y_ref))}")

    # bf16-weight path (MXU-native on v6e/v7x): loose numerical check.
    y_bf16 = text_subnet_forward(x, params, weights_dtype=jnp.bfloat16)
    y_bf16 = jax.block_until_ready(y_bf16)
    assert y_bf16.shape == (B, OUT)
    assert bool(jnp.all(jnp.isfinite(y_bf16)))
    assert jnp.allclose(y_bf16, y_ref, atol=1e-1, rtol=1e-1), (
        f"bf16 max abs diff {jnp.max(jnp.abs(y_bf16 - y_ref))}")

    print("KERNEL_OK")
</pallas_src>

<mosaic_0001>
module attributes {stable_mosaic.version = 11 : i64} {
  func.func @_lstm_textsubnet_kernel(%arg0: i32, %arg1: memref<2x8x32xf32, #tpu.memory_space<vmem>>, %arg2: memref<32x128xf32, #tpu.memory_space<vmem>>, %arg3: memref<32x128xf32, #tpu.memory_space<vmem>>, %arg4: memref<1x128xf32, #tpu.memory_space<vmem>>, %arg5: memref<32x16xf32, #tpu.memory_space<vmem>>, %arg6: memref<1x16xf32, #tpu.memory_space<vmem>>, %arg7: memref<2x16xf32, #tpu.memory_space<vmem>>, %arg8: memref<2x32xf32, #tpu.memory_space<vmem>>, %arg9: memref<2x32xf32, #tpu.memory_space<vmem>>) attributes {dimension_semantics = [#tpu.dimension_semantics<arbitrary>], iteration_bounds = array<i64: 1>, scalar_prefetch = 0 : i64, scratch_operands = 2 : i64, tpu.core_type = #tpu.core_type<tc>, window_params = [{transform_indices = @transform_0, window_bounds = array<i64: 2, 8, 32>}, {pipeline_mode = #tpu.pipeline_mode<synchronous>, transform_indices = @transform_1, window_bounds = array<i64: 32, 128>}, {pipeline_mode = #tpu.pipeline_mode<synchronous>, transform_indices = @transform_2, window_bounds = array<i64: 32, 128>}, {pipeline_mode = #tpu.pipeline_mode<synchronous>, transform_indices = @transform_3, window_bounds = array<i64: 1, 128>}, {pipeline_mode = #tpu.pipeline_mode<synchronous>, transform_indices = @transform_4, window_bounds = array<i64: 32, 16>}, {pipeline_mode = #tpu.pipeline_mode<synchronous>, transform_indices = @transform_5, window_bounds = array<i64: 1, 16>}, {pipeline_mode = #tpu.pipeline_mode<synchronous>, transform_indices = @transform_6, window_bounds = array<i64: 2, 16>}]} {
    %c0_i32 = arith.constant 0 : i32
    %0 = arith.cmpi eq, %arg0, %c0_i32 : i32
    %1 = arith.extui %0 : i1 to i32
    %c0_i32_0 = arith.constant 0 : i32
    %2 = arith.cmpi ne, %1, %c0_i32_0 : i32
    scf.if %2 {
      %cst_72 = arith.constant 0.000000e+00 : f32
      %263 = vector.broadcast %cst_72 : f32 to vector<2x32xf32>
      %c0_73 = arith.constant 0 : index
      %c0_74 = arith.constant 0 : index
      %264 = vector.load %arg8[%c0_73, %c0_74] : memref<2x32xf32, #tpu.memory_space<vmem>>, vector<2x32xf32>
      tpu.vector_store %arg8[%c0_73, %c0_74], %263 {strides = array<i32>} : memref<2x32xf32, #tpu.memory_space<vmem>>, vector<2x32xf32>,
      %cst_75 = arith.constant 0.000000e+00 : f32
      %265 = vector.broadcast %cst_75 : f32 to vector<2x32xf32>
      %c0_76 = arith.constant 0 : index
      %c0_77 = arith.constant 0 : index
      %266 = vector.load %arg9[%c0_76, %c0_77] : memref<2x32xf32, #tpu.memory_space<vmem>>, vector<2x32xf32>
      tpu.vector_store %arg9[%c0_76, %c0_77], %265 {strides = array<i32>} : memref<2x32xf32, #tpu.memory_space<vmem>>, vector<2x32xf32>,
    } else {
    }
    %c0 = arith.constant 0 : index
    %c0_1 = arith.constant 0 : index
    %3 = vector.load %arg2[%c0, %c0_1] : memref<32x128xf32, #tpu.memory_space<vmem>>, vector<32x128xf32>
    %c0_2 = arith.constant 0 : index
    %c0_3 = arith.constant 0 : index
    %4 = vector.load %arg3[%c0_2, %c0_3] : memref<32x128xf32, #tpu.memory_space<vmem>>, vector<32x128xf32>
    %c0_4 = arith.constant 0 : index
    %c0_5 = arith.constant 0 : index
    %5 = vector.load %arg4[%c0_4, %c0_5] : memref<1x128xf32, #tpu.memory_space<vmem>>, vector<1x128xf32>
    %6 = vector.shape_cast %5 : vector<1x128xf32> to vector<1x128xf32>
    %7 = vector.broadcast %6 : vector<1x128xf32> to vector<2x128xf32>
    %c0_6 = arith.constant 0 : index
    %c0_7 = arith.constant 0 : index
    %8 = vector.load %arg8[%c0_6, %c0_7] : memref<2x32xf32, #tpu.memory_space<vmem>>, vector<2x32xf32>
    %c0_8 = arith.constant 0 : index
    %c0_9 = arith.constant 0 : index
    %9 = vector.load %arg9[%c0_8, %c0_9] : memref<2x32xf32, #tpu.memory_space<vmem>>, vector<2x32xf32>
    %c0_10 = arith.constant 0 : index
    %c0_11 = arith.constant 0 : index
    %c0_12 = arith.constant 0 : index
    %10 = vector.load %arg1[%c0_10, %c0_11, %c0_12] : memref<2x8x32xf32, #tpu.memory_space<vmem>>, vector<2x1x32xf32>
    %11 = vector.shape_cast %10 : vector<2x1x32xf32> to vector<2x32xf32>
    %cst = arith.constant dense<0.000000e+00> : vector<2x128xf32>
    %12 = tpu.matmul %11, %3, %cst {dimension_numbers = #tpu.dot_dimension_numbers<[1], [0], [0], [1], [0, 0, 1, 1], [], []>} : vector<2x32xf32>, vector<32x128xf32>, vector<2x128xf32> -> vector<2x128xf32>
    %cst_13 = arith.constant dense<0.000000e+00> : vector<2x128xf32>
    %13 = tpu.matmul %8, %4, %cst_13 {dimension_numbers = #tpu.dot_dimension_numbers<[1], [0], [0], [1], [0, 0, 1, 1], [], []>} : vector<2x32xf32>, vector<32x128xf32>, vector<2x128xf32> -> vector<2x128xf32>
    %14 = arith.addf %12, %13 : vector<2x128xf32>
    %15 = arith.addf %14, %7 : vector<2x128xf32>
    %16 = vector.extract_strided_slice %15 {offsets = [0, 0], sizes = [2, 32], strides = [1, 1]} : vector<2x128xf32> to vector<2x32xf32>
    %17 = arith.negf %16 : vector<2x32xf32>
    %18 = math.exp %17 : vector<2x32xf32>
    %cst_14 = arith.constant 1.000000e+00 : f32
    %19 = vector.broadcast %cst_14 : f32 to vector<2x32xf32>
    %20 = arith.addf %19, %18 : vector<2x32xf32>
    %21 = arith.divf %19, %20 : vector<2x32xf32>
    %22 = vector.extract_strided_slice %15 {offsets = [0, 32], sizes = [2, 32], strides = [1, 1]} : vector<2x128xf32> to vector<2x32xf32>
    %23 = arith.negf %22 : vector<2x32xf32>
    %24 = math.exp %23 : vector<2x32xf32>
    %cst_15 = arith.constant 1.000000e+00 : f32
    %25 = vector.broadcast %cst_15 : f32 to vector<2x32xf32>
    %26 = arith.addf %25, %24 : vector<2x32xf32>
    %27 = arith.divf %25, %26 : vector<2x32xf32>
    %28 = vector.extract_strided_slice %15 {offsets = [0, 64], sizes = [2, 32], strides = [1, 1]} : vector<2x128xf32> to vector<2x32xf32>
    %29 = math.tanh %28 : vector<2x32xf32>
    %30 = vector.extract_strided_slice %15 {offsets = [0, 96], sizes = [2, 32], strides = [1, 1]} : vector<2x128xf32> to vector<2x32xf32>
    %31 = arith.negf %30 : vector<2x32xf32>
    %32 = math.exp %31 : vector<2x32xf32>
    %cst_16 = arith.constant 1.000000e+00 : f32
    %33 = vector.broadcast %cst_16 : f32 to vector<2x32xf32>
    %34 = arith.addf %33, %32 : vector<2x32xf32>
    %35 = arith.divf %33, %34 : vector<2x32xf32>
    %36 = arith.mulf %27, %9 : vector<2x32xf32>
    %37 = arith.mulf %21, %29 : vector<2x32xf32>
    %38 = arith.addf %36, %37 : vector<2x32xf32>
    %39 = math.tanh %38 : vector<2x32xf32>
    %40 = arith.mulf %35, %39 : vector<2x32xf32>
    %c0_17 = arith.constant 0 : index
    %c1 = arith.constant 1 : index
    %c0_18 = arith.constant 0 : index
    %41 = vector.load %arg1[%c0_17, %c1, %c0_18] : memref<2x8x32xf32, #tpu.memory_space<vmem>>, vector<2x1x32xf32>
    %42 = vector.shape_cast %41 : vector<2x1x32xf32> to vector<2x32xf32>
    %cst_19 = arith.constant dense<0.000000e+00> : vector<2x128xf32>
    %43 = tpu.matmul %42, %3, %cst_19 {dimension_numbers = #tpu.dot_dimension_numbers<[1], [0], [0], [1], [0, 0, 1, 1], [], []>} : vector<2x32xf32>, vector<32x128xf32>, vector<2x128xf32> -> vector<2x128xf32>
    %cst_20 = arith.constant dense<0.000000e+00> : vector<2x128xf32>
    %44 = tpu.matmul %40, %4, %cst_20 {dimension_numbers = #tpu.dot_dimension_numbers<[1], [0], [0], [1], [0, 0, 1, 1], [], []>} : vector<2x32xf32>, vector<32x128xf32>, vector<2x128xf32> -> vector<2x128xf32>
    %45 = arith.addf %43, %44 : vector<2x128xf32>
    %46 = arith.addf %45, %7 : vector<2x128xf32>
    %47 = vector.extract_strided_slice %46 {offsets = [0, 0], sizes = [2, 32], strides = [1, 1]} : vector<2x128xf32> to vector<2x32xf32>
    %48 = arith.negf %47 : vector<2x32xf32>
    %49 = math.exp %48 : vector<2x32xf32>
    %cst_21 = arith.constant 1.000000e+00 : f32
    %50 = vector.broadcast %cst_21 : f32 to vector<2x32xf32>
    %51 = arith.addf %50, %49 : vector<2x32xf32>
    %52 = arith.divf %50, %51 : vector<2x32xf32>
    %53 = vector.extract_strided_slice %46 {offsets = [0, 32], sizes = [2, 32], strides = [1, 1]} : vector<2x128xf32> to vector<2x32xf32>
    %54 = arith.negf %53 : vector<2x32xf32>
    %55 = math.exp %54 : vector<2x32xf32>
    %cst_22 = arith.constant 1.000000e+00 : f32
    %56 = vector.broadcast %cst_22 : f32 to vector<2x32xf32>
    %57 = arith.addf %56, %55 : vector<2x32xf32>
    %58 = arith.divf %56, %57 : vector<2x32xf32>
    %59 = vector.extract_strided_slice %46 {offsets = [0, 64], sizes = [2, 32], strides = [1, 1]} : vector<2x128xf32> to vector<2x32xf32>
    %60 = math.tanh %59 : vector<2x32xf32>
    %61 = vector.extract_strided_slice %46 {offsets = [0, 96], sizes = [2, 32], strides = [1, 1]} : vector<2x128xf32> to vector<2x32xf32>
    %62 = arith.negf %61 : vector<2x32xf32>
    %63 = math.exp %62 : vector<2x32xf32>
    %cst_23 = arith.constant 1.000000e+00 : f32
    %64 = vector.broadcast %cst_23 : f32 to vector<2x32xf32>
    %65 = arith.addf %64, %63 : vector<2x32xf32>
    %66 = arith.divf %64, %65 : vector<2x32xf32>
    %67 = arith.mulf %58, %38 : vector<2x32xf32>
    %68 = arith.mulf %52, %60 : vector<2x32xf32>
    %69 = arith.addf %67, %68 : vector<2x32xf32>
    %70 = math.tanh %69 : vector<2x32xf32>
    %71 = arith.mulf %66, %70 : vector<2x32xf32>
    %c0_24 = arith.constant 0 : index
    %c2 = arith.constant 2 : index
    %c0_25 = arith.constant 0 : index
    %72 = vector.load %arg1[%c0_24, %c2, %c0_25] : memref<2x8x32xf32, #tpu.memory_space<vmem>>, vector<2x1x32xf32>
    %73 = vector.shape_cast %72 : vector<2x1x32xf32> to vector<2x32xf32>
    %cst_26 = arith.constant dense<0.000000e+00> : vector<2x128xf32>
    %74 = tpu.matmul %73, %3, %cst_26 {dimension_numbers = #tpu.dot_dimension_numbers<[1], [0], [0], [1], [0, 0, 1, 1], [], []>} : vector<2x32xf32>, vector<32x128xf32>, vector<2x128xf32> -> vector<2x128xf32>
    %cst_27 = arith.constant dense<0.000000e+00> : vector<2x128xf32>
    %75 = tpu.matmul %71, %4, %cst_27 {dimension_numbers = #tpu.dot_dimension_numbers<[1], [0], [0], [1], [0, 0, 1, 1], [], []>} : vector<2x32xf32>, vector<32x128xf32>, vector<2x128xf32> -> vector<2x128xf32>
    %76 = arith.addf %74, %75 : vector<2x128xf32>
    %77 = arith.addf %76, %7 : vector<2x128xf32>
    %78 = vector.extract_strided_slice %77 {offsets = [0, 0], sizes = [2, 32], strides = [1, 1]} : vector<2x128xf32> to vector<2x32xf32>
    %79 = arith.negf %78 : vector<2x32xf32>
    %80 = math.exp %79 : vector<2x32xf32>
    %cst_28 = arith.constant 1.000000e+00 : f32
    %81 = vector.broadcast %cst_28 : f32 to vector<2x32xf32>
    %82 = arith.addf %81, %80 : vector<2x32xf32>
    %83 = arith.divf %81, %82 : vector<2x32xf32>
    %84 = vector.extract_strided_slice %77 {offsets = [0, 32], sizes = [2, 32], strides = [1, 1]} : vector<2x128xf32> to vector<2x32xf32>
    %85 = arith.negf %84 : vector<2x32xf32>
    %86 = math.exp %85 : vector<2x32xf32>
    %cst_29 = arith.constant 1.000000e+00 : f32
    %87 = vector.broadcast %cst_29 : f32 to vector<2x32xf32>
    %88 = arith.addf %87, %86 : vector<2x32xf32>
    %89 = arith.divf %87, %88 : vector<2x32xf32>
    %90 = vector.extract_strided_slice %77 {offsets = [0, 64], sizes = [2, 32], strides = [1, 1]} : vector<2x128xf32> to vector<2x32xf32>
    %91 = math.tanh %90 : vector<2x32xf32>
    %92 = vector.extract_strided_slice %77 {offsets = [0, 96], sizes = [2, 32], strides = [1, 1]} : vector<2x128xf32> to vector<2x32xf32>
    %93 = arith.negf %92 : vector<2x32xf32>
    %94 = math.exp %93 : vector<2x32xf32>
    %cst_30 = arith.constant 1.000000e+00 : f32
    %95 = vector.broadcast %cst_30 : f32 to vector<2x32xf32>
    %96 = arith.addf %95, %94 : vector<2x32xf32>
    %97 = arith.divf %95, %96 : vector<2x32xf32>
    %98 = arith.mulf %89, %69 : vector<2x32xf32>
    %99 = arith.mulf %83, %91 : vector<2x32xf32>
    %100 = arith.addf %98, %99 : vector<2x32xf32>
    %101 = math.tanh %100 : vector<2x32xf32>
    %102 = arith.mulf %97, %101 : vector<2x32xf32>
    %c0_31 = arith.constant 0 : index
    %c3 = arith.constant 3 : index
    %c0_32 = arith.constant 0 : index
    %103 = vector.load %arg1[%c0_31, %c3, %c0_32] : memref<2x8x32xf32, #tpu.memory_space<vmem>>, vector<2x1x32xf32>
    %104 = vector.shape_cast %103 : vector<2x1x32xf32> to vector<2x32xf32>
    %cst_33 = arith.constant dense<0.000000e+00> : vector<2x128xf32>
    %105 = tpu.matmul %104, %3, %cst_33 {dimension_numbers = #tpu.dot_dimension_numbers<[1], [0], [0], [1], [0, 0, 1, 1], [], []>} : vector<2x32xf32>, vector<32x128xf32>, vector<2x128xf32> -> vector<2x128xf32>
    %cst_34 = arith.constant dense<0.000000e+00> : vector<2x128xf32>
    %106 = tpu.matmul %102, %4, %cst_34 {dimension_numbers = #tpu.dot_dimension_numbers<[1], [0], [0], [1], [0, 0, 1, 1], [], []>} : vector<2x32xf32>, vector<32x128xf32>, vector<2x128xf32> -> vector<2x128xf32>
    %107 = arith.addf %105, %106 : vector<2x128xf32>
    %108 = arith.addf %107, %7 : vector<2x128xf32>
    %109 = vector.extract_strided_slice %108 {offsets = [0, 0], sizes = [2, 32], strides = [1, 1]} : vector<2x128xf32> to vector<2x32xf32>
    %110 = arith.negf %109 : vector<2x32xf32>
    %111 = math.exp %110 : vector<2x32xf32>
    %cst_35 = arith.constant 1.000000e+00 : f32
    %112 = vector.broadcast %cst_35 : f32 to vector<2x32xf32>
    %113 = arith.addf %112, %111 : vector<2x32xf32>
    %114 = arith.divf %112, %113 : vector<2x32xf32>
    %115 = vector.extract_strided_slice %108 {offsets = [0, 32], sizes = [2, 32], strides = [1, 1]} : vector<2x128xf32> to vector<2x32xf32>
    %116 = arith.negf %115 : vector<2x32xf32>
    %117 = math.exp %116 : vector<2x32xf32>
    %cst_36 = arith.constant 1.000000e+00 : f32
    %118 = vector.broadcast %cst_36 : f32 to vector<2x32xf32>
    %119 = arith.addf %118, %117 : vector<2x32xf32>
    %120 = arith.divf %118, %119 : vector<2x32xf32>
    %121 = vector.extract_strided_slice %108 {offsets = [0, 64], sizes = [2, 32], strides = [1, 1]} : vector<2x128xf32> to vector<2x32xf32>
    %122 = math.tanh %121 : vector<2x32xf32>
    %123 = vector.extract_strided_slice %108 {offsets = [0, 96], sizes = [2, 32], strides = [1, 1]} : vector<2x128xf32> to vector<2x32xf32>
    %124 = arith.negf %123 : vector<2x32xf32>
    %125 = math.exp %124 : vector<2x32xf32>
    %cst_37 = arith.constant 1.000000e+00 : f32
    %126 = vector.broadcast %cst_37 : f32 to vector<2x32xf32>
    %127 = arith.addf %126, %125 : vector<2x32xf32>
    %128 = arith.divf %126, %127 : vector<2x32xf32>
    %129 = arith.mulf %120, %100 : vector<2x32xf32>
    %130 = arith.mulf %114, %122 : vector<2x32xf32>
    %131 = arith.addf %129, %130 : vector<2x32xf32>
    %132 = math.tanh %131 : vector<2x32xf32>
    %133 = arith.mulf %128, %132 : vector<2x32xf32>
    %c0_38 = arith.constant 0 : index
    %c4 = arith.constant 4 : index
    %c0_39 = arith.constant 0 : index
    %134 = vector.load %arg1[%c0_38, %c4, %c0_39] : memref<2x8x32xf32, #tpu.memory_space<vmem>>, vector<2x1x32xf32>
    %135 = vector.shape_cast %134 : vector<2x1x32xf32> to vector<2x32xf32>
    %cst_40 = arith.constant dense<0.000000e+00> : vector<2x128xf32>
    %136 = tpu.matmul %135, %3, %cst_40 {dimension_numbers = #tpu.dot_dimension_numbers<[1], [0], [0], [1], [0, 0, 1, 1], [], []>} : vector<2x32xf32>, vector<32x128xf32>, vector<2x128xf32> -> vector<2x128xf32>
    %cst_41 = arith.constant dense<0.000000e+00> : vector<2x128xf32>
    %137 = tpu.matmul %133, %4, %cst_41 {dimension_numbers = #tpu.dot_dimension_numbers<[1], [0], [0], [1], [0, 0, 1, 1], [], []>} : vector<2x32xf32>, vector<32x128xf32>, vector<2x128xf32> -> vector<2x128xf32>
    %138 = arith.addf %136, %137 : vector<2x128xf32>
    %139 = arith.addf %138, %7 : vector<2x128xf32>
    %140 = vector.extract_strided_slice %139 {offsets = [0, 0], sizes = [2, 32], strides = [1, 1]} : vector<2x128xf32> to vector<2x32xf32>
    %141 = arith.negf %140 : vector<2x32xf32>
    %142 = math.exp %141 : vector<2x32xf32>
    %cst_42 = arith.constant 1.000000e+00 : f32
    %143 = vector.broadcast %cst_42 : f32 to vector<2x32xf32>
    %144 = arith.addf %143, %142 : vector<2x32xf32>
    %145 = arith.divf %143, %144 : vector<2x32xf32>
    %146 = vector.extract_strided_slice %139 {offsets = [0, 32], sizes = [2, 32], strides = [1, 1]} : vector<2x128xf32> to vector<2x32xf32>
    %147 = arith.negf %146 : vector<2x32xf32>
    %148 = math.exp %147 : vector<2x32xf32>
    %cst_43 = arith.constant 1.000000e+00 : f32
    %149 = vector.broadcast %cst_43 : f32 to vector<2x32xf32>
    %150 = arith.addf %149, %148 : vector<2x32xf32>
    %151 = arith.divf %149, %150 : vector<2x32xf32>
    %152 = vector.extract_strided_slice %139 {offsets = [0, 64], sizes = [2, 32], strides = [1, 1]} : vector<2x128xf32> to vector<2x32xf32>
    %153 = math.tanh %152 : vector<2x32xf32>
    %154 = vector.extract_strided_slice %139 {offsets = [0, 96], sizes = [2, 32], strides = [1, 1]} : vector<2x128xf32> to vector<2x32xf32>
    %155 = arith.negf %154 : vector<2x32xf32>
    %156 = math.exp %155 : vector<2x32xf32>
    %cst_44 = arith.constant 1.000000e+00 : f32
    %157 = vector.broadcast %cst_44 : f32 to vector<2x32xf32>
    %158 = arith.addf %157, %156 : vector<2x32xf32>
    %159 = arith.divf %157, %158 : vector<2x32xf32>
    %160 = arith.mulf %151, %131 : vector<2x32xf32>
    %161 = arith.mulf %145, %153 : vector<2x32xf32>
    %162 = arith.addf %160, %161 : vector<2x32xf32>
    %163 = math.tanh %162 : vector<2x32xf32>
    %164 = arith.mulf %159, %163 : vector<2x32xf32>
    %c0_45 = arith.constant 0 : index
    %c5 = arith.constant 5 : index
    %c0_46 = arith.constant 0 : index
    %165 = vector.load %arg1[%c0_45, %c5, %c0_46] : memref<2x8x32xf32, #tpu.memory_space<vmem>>, vector<2x1x32xf32>
    %166 = vector.shape_cast %165 : vector<2x1x32xf32> to vector<2x32xf32>
    %cst_47 = arith.constant dense<0.000000e+00> : vector<2x128xf32>
    %167 = tpu.matmul %166, %3, %cst_47 {dimension_numbers = #tpu.dot_dimension_numbers<[1], [0], [0], [1], [0, 0, 1, 1], [], []>} : vector<2x32xf32>, vector<32x128xf32>, vector<2x128xf32> -> vector<2x128xf32>
    %cst_48 = arith.constant dense<0.000000e+00> : vector<2x128xf32>
    %168 = tpu.matmul %164, %4, %cst_48 {dimension_numbers = #tpu.dot_dimension_numbers<[1], [0], [0], [1], [0, 0, 1, 1], [], []>} : vector<2x32xf32>, vector<32x128xf32>, vector<2x128xf32> -> vector<2x128xf32>
    %169 = arith.addf %167, %168 : vector<2x128xf32>
    %170 = arith.addf %169, %7 : vector<2x128xf32>
    %171 = vector.extract_strided_slice %170 {offsets = [0, 0], sizes = [2, 32], strides = [1, 1]} : vector<2x128xf32> to vector<2x32xf32>
    %172 = arith.negf %171 : vector<2x32xf32>
    %173 = math.exp %172 : vector<2x32xf32>
    %cst_49 = arith.constant 1.000000e+00 : f32
    %174 = vector.broadcast %cst_49 : f32 to vector<2x32xf32>
    %175 = arith.addf %174, %173 : vector<2x32xf32>
    %176 = arith.divf %174, %175 : vector<2x32xf32>
    %177 = vector.extract_strided_slice %170 {offsets = [0, 32], sizes = [2, 32], strides = [1, 1]} : vector<2x128xf32> to vector<2x32xf32>
    %178 = arith.negf %177 : vector<2x32xf32>
    %179 = math.exp %178 : vector<2x32xf32>
    %cst_50 = arith.constant 1.000000e+00 : f32
    %180 = vector.broadcast %cst_50 : f32 to vector<2x32xf32>
    %181 = arith.addf %180, %179 : vector<2x32xf32>
    %182 = arith.divf %180, %181 : vector<2x32xf32>
    %183 = vector.extract_strided_slice %170 {offsets = [0, 64], sizes = [2, 32], strides = [1, 1]} : vector<2x128xf32> to vector<2x32xf32>
    %184 = math.tanh %183 : vector<2x32xf32>
    %185 = vector.extract_strided_slice %170 {offsets = [0, 96], sizes = [2, 32], strides = [1, 1]} : vector<2x128xf32> to vector<2x32xf32>
    %186 = arith.negf %185 : vector<2x32xf32>
    %187 = math.exp %186 : vector<2x32xf32>
    %cst_51 = arith.constant 1.000000e+00 : f32
    %188 = vector.broadcast %cst_51 : f32 to vector<2x32xf32>
    %189 = arith.addf %188, %187 : vector<2x32xf32>
    %190 = arith.divf %188, %189 : vector<2x32xf32>
    %191 = arith.mulf %182, %162 : vector<2x32xf32>
    %192 = arith.mulf %176, %184 : vector<2x32xf32>
    %193 = arith.addf %191, %192 : vector<2x32xf32>
    %194 = math.tanh %193 : vector<2x32xf32>
    %195 = arith.mulf %190, %194 : vector<2x32xf32>
    %c0_52 = arith.constant 0 : index
    %c6 = arith.constant 6 : index
    %c0_53 = arith.constant 0 : index
    %196 = vector.load %arg1[%c0_52, %c6, %c0_53] : memref<2x8x32xf32, #tpu.memory_space<vmem>>, vector<2x1x32xf32>
    %197 = vector.shape_cast %196 : vector<2x1x32xf32> to vector<2x32xf32>
    %cst_54 = arith.constant dense<0.000000e+00> : vector<2x128xf32>
    %198 = tpu.matmul %197, %3, %cst_54 {dimension_numbers = #tpu.dot_dimension_numbers<[1], [0], [0], [1], [0, 0, 1, 1], [], []>} : vector<2x32xf32>, vector<32x128xf32>, vector<2x128xf32> -> vector<2x128xf32>
    %cst_55 = arith.constant dense<0.000000e+00> : vector<2x128xf32>
    %199 = tpu.matmul %195, %4, %cst_55 {dimension_numbers = #tpu.dot_dimension_numbers<[1], [0], [0], [1], [0, 0, 1, 1], [], []>} : vector<2x32xf32>, vector<32x128xf32>, vector<2x128xf32> -> vector<2x128xf32>
    %200 = arith.addf %198, %199 : vector<2x128xf32>
    %201 = arith.addf %200, %7 : vector<2x128xf32>
    %202 = vector.extract_strided_slice %201 {offsets = [0, 0], sizes = [2, 32], strides = [1, 1]} : vector<2x128xf32> to vector<2x32xf32>
    %203 = arith.negf %202 : vector<2x32xf32>
    %204 = math.exp %203 : vector<2x32xf32>
    %cst_56 = arith.constant 1.000000e+00 : f32
    %205 = vector.broadcast %cst_56 : f32 to vector<2x32xf32>
    %206 = arith.addf %205, %204 : vector<2x32xf32>
    %207 = arith.divf %205, %206 : vector<2x32xf32>
    %208 = vector.extract_strided_slice %201 {offsets = [0, 32], sizes = [2, 32], strides = [1, 1]} : vector<2x128xf32> to vector<2x32xf32>
    %209 = arith.negf %208 : vector<2x32xf32>
    %210 = math.exp %209 : vector<2x32xf32>
    %cst_57 = arith.constant 1.000000e+00 : f32
    %211 = vector.broadcast %cst_57 : f32 to vector<2x32xf32>
    %212 = arith.addf %211, %210 : vector<2x32xf32>
    %213 = arith.divf %211, %212 : vector<2x32xf32>
    %214 = vector.extract_strided_slice %201 {offsets = [0, 64], sizes = [2, 32], strides = [1, 1]} : vector<2x128xf32> to vector<2x32xf32>
    %215 = math.tanh %214 : vector<2x32xf32>
    %216 = vector.extract_strided_slice %201 {offsets = [0, 96], sizes = [2, 32], strides = [1, 1]} : vector<2x128xf32> to vector<2x32xf32>
    %217 = arith.negf %216 : vector<2x32xf32>
    %218 = math.exp %217 : vector<2x32xf32>
    %cst_58 = arith.constant 1.000000e+00 : f32
    %219 = vector.broadcast %cst_58 : f32 to vector<2x32xf32>
    %220 = arith.addf %219, %218 : vector<2x32xf32>
    %221 = arith.divf %219, %220 : vector<2x32xf32>
    %222 = arith.mulf %213, %193 : vector<2x32xf32>
    %223 = arith.mulf %207, %215 : vector<2x32xf32>
    %224 = arith.addf %222, %223 : vector<2x32xf32>
    %225 = math.tanh %224 : vector<2x32xf32>
    %226 = arith.mulf %221, %225 : vector<2x32xf32>
    %c0_59 = arith.constant 0 : index
    %c7 = arith.constant 7 : index
    %c0_60 = arith.constant 0 : index
    %227 = vector.load %arg1[%c0_59, %c7, %c0_60] : memref<2x8x32xf32, #tpu.memory_space<vmem>>, vector<2x1x32xf32>
    %228 = vector.shape_cast %227 : vector<2x1x32xf32> to vector<2x32xf32>
    %cst_61 = arith.constant dense<0.000000e+00> : vector<2x128xf32>
    %229 = tpu.matmul %228, %3, %cst_61 {dimension_numbers = #tpu.dot_dimension_numbers<[1], [0], [0], [1], [0, 0, 1, 1], [], []>} : vector<2x32xf32>, vector<32x128xf32>, vector<2x128xf32> -> vector<2x128xf32>
    %cst_62 = arith.constant dense<0.000000e+00> : vector<2x128xf32>
    %230 = tpu.matmul %226, %4, %cst_62 {dimension_numbers = #tpu.dot_dimension_numbers<[1], [0], [0], [1], [0, 0, 1, 1], [], []>} : vector<2x32xf32>, vector<32x128xf32>, vector<2x128xf32> -> vector<2x128xf32>
    %231 = arith.addf %229, %230 : vector<2x128xf32>
    %232 = arith.addf %231, %7 : vector<2x128xf32>
    %233 = vector.extract_strided_slice %232 {offsets = [0, 0], sizes = [2, 32], strides = [1, 1]} : vector<2x128xf32> to vector<2x32xf32>
    %234 = arith.negf %233 : vector<2x32xf32>
    %235 = math.exp %234 : vector<2x32xf32>
    %cst_63 = arith.constant 1.000000e+00 : f32
    %236 = vector.broadcast %cst_63 : f32 to vector<2x32xf32>
    %237 = arith.addf %236, %235 : vector<2x32xf32>
    %238 = arith.divf %236, %237 : vector<2x32xf32>
    %239 = vector.extract_strided_slice %232 {offsets = [0, 32], sizes = [2, 32], strides = [1, 1]} : vector<2x128xf32> to vector<2x32xf32>
    %240 = arith.negf %239 : vector<2x32xf32>
    %241 = math.exp %240 : vector<2x32xf32>
    %cst_64 = arith.constant 1.000000e+00 : f32
    %242 = vector.broadcast %cst_64 : f32 to vector<2x32xf32>
    %243 = arith.addf %242, %241 : vector<2x32xf32>
    %244 = arith.divf %242, %243 : vector<2x32xf32>
    %245 = vector.extract_strided_slice %232 {offsets = [0, 64], sizes = [2, 32], strides = [1, 1]} : vector<2x128xf32> to vector<2x32xf32>
    %246 = math.tanh %245 : vector<2x32xf32>
    %247 = vector.extract_strided_slice %232 {offsets = [0, 96], sizes = [2, 32], strides = [1, 1]} : vector<2x128xf32> to vector<2x32xf32>
    %248 = arith.negf %247 : vector<2x32xf32>
    %249 = math.exp %248 : vector<2x32xf32>
    %cst_65 = arith.constant 1.000000e+00 : f32
    %250 = vector.broadcast %cst_65 : f32 to vector<2x32xf32>
    %251 = arith.addf %250, %249 : vector<2x32xf32>
    %252 = arith.divf %250, %251 : vector<2x32xf32>
    %253 = arith.mulf %244, %224 : vector<2x32xf32>
    %254 = arith.mulf %238, %246 : vector<2x32xf32>
    %255 = arith.addf %253, %254 : vector<2x32xf32>
    %256 = math.tanh %255 : vector<2x32xf32>
    %257 = arith.mulf %252, %256 : vector<2x32xf32>
    %c0_66 = arith.constant 0 : index
    %c0_67 = arith.constant 0 : index
    %258 = vector.load %arg8[%c0_66, %c0_67] : memref<2x32xf32, #tpu.memory_space<vmem>>, vector<2x32xf32>
    tpu.vector_store %arg8[%c0_66, %c0_67], %257 {strides = array<i32>} : memref<2x32xf32, #tpu.memory_space<vmem>>, vector<2x32xf32>,
    %c0_68 = arith.constant 0 : index
    %c0_69 = arith.constant 0 : index
    %259 = vector.load %arg9[%c0_68, %c0_69] : memref<2x32xf32, #tpu.memory_space<vmem>>, vector<2x32xf32>
    tpu.vector_store %arg9[%c0_68, %c0_69], %255 {strides = array<i32>} : memref<2x32xf32, #tpu.memory_space<vmem>>, vector<2x32xf32>,
    %c0_i32_70 = arith.constant 0 : i32
    %260 = arith.cmpi eq, %arg0, %c0_i32_70 : i32
    %261 = arith.extui %260 : i1 to i32
    %c0_i32_71 = arith.constant 0 : i32
    %262 = arith.cmpi ne, %261, %c0_i32_71 : i32
    scf.if %262 {
      %c0_72 = arith.constant 0 : index
      %c0_73 = arith.constant 0 : index
      %263 = vector.load %arg5[%c0_72, %c0_73] : memref<32x16xf32, #tpu.memory_space<vmem>>, vector<32x16xf32>
      %cst_74 = arith.constant dense<0.000000e+00> : vector<2x16xf32>
      %264 = tpu.matmul %257, %263, %cst_74 {dimension_numbers = #tpu.dot_dimension_numbers<[1], [0], [0], [1], [0, 0, 1, 1], [], []>} : vector<2x32xf32>, vector<32x16xf32>, vector<2x16xf32> -> vector<2x16xf32>
      %c0_75 = arith.constant 0 : index
      %c0_76 = arith.constant 0 : index
      %265 = vector.load %arg6[%c0_75, %c0_76] : memref<1x16xf32, #tpu.memory_space<vmem>>, vector<1x16xf32>
      %266 = vector.broadcast %265 : vector<1x16xf32> to vector<2x16xf32>
      %267 = arith.addf %264, %266 : vector<2x16xf32>
      %c0_77 = arith.constant 0 : index
      %c0_78 = arith.constant 0 : index
      %268 = vector.load %arg7[%c0_77, %c0_78] : memref<2x16xf32, #tpu.memory_space<vmem>>, vector<2x16xf32>
      tpu.vector_store %arg7[%c0_77, %c0_78], %267 {strides = array<i32>} : memref<2x16xf32, #tpu.memory_space<vmem>>, vector<2x16xf32>,
    } else {
    }
    return
  }
  func.func @transform_0(%arg0: i32) -> (i32, i32, i32) {
    %c0_i32 = arith.constant 0 : i32
    %c0_i32_0 = arith.constant 0 : i32
    %c0_i32_1 = arith.constant 0 : i32
    return %c0_i32, %arg0, %c0_i32_0 : i32, i32, i32
  }
  func.func @transform_1(%arg0: i32) -> (i32, i32) {
    %c0_i32 = arith.constant 0 : i32
    %c0_i32_0 = arith.constant 0 : i32
    %c0_i32_1 = arith.constant 0 : i32
    return %c0_i32, %c0_i32_0 : i32, i32
  }
  func.func @transform_2(%arg0: i32) -> (i32, i32) {
    %c0_i32 = arith.constant 0 : i32
    %c0_i32_0 = arith.constant 0 : i32
    %c0_i32_1 = arith.constant 0 : i32
    return %c0_i32, %c0_i32_0 : i32, i32
  }
  func.func @transform_3(%arg0: i32) -> (i32, i32) {
    %c0_i32 = arith.constant 0 : i32
    %c0_i32_0 = arith.constant 0 : i32
    %c0_i32_1 = arith.constant 0 : i32
    return %c0_i32, %c0_i32_0 : i32, i32
  }
  func.func @transform_4(%arg0: i32) -> (i32, i32) {
    %c0_i32 = arith.constant 0 : i32
    %c0_i32_0 = arith.constant 0 : i32
    %c0_i32_1 = arith.constant 0 : i32
    return %c0_i32, %c0_i32_0 : i32, i32
  }
  func.func @transform_5(%arg0: i32) -> (i32, i32) {
    %c0_i32 = arith.constant 0 : i32
    %c0_i32_0 = arith.constant 0 : i32
    %c0_i32_1 = arith.constant 0 : i32
    return %c0_i32, %c0_i32_0 : i32, i32
  }
  func.func @transform_6(%arg0: i32) -> (i32, i32) {
    %c0_i32 = arith.constant 0 : i32
    %c0_i32_0 = arith.constant 0 : i32
    %c0_i32_1 = arith.constant 0 : i32
    return %c0_i32, %c0_i32_0 : i32, i32
  }
}

</mosaic_0001>

<bundles_post_ra>
// kernel: tpu_custom_call.1
= control target key start
LH: loop header
LB: loop body
LE: loop exit
PB: predicated region body
PF: predicated region fallthrough
CT: control target
= control target key end

     0   :  { %11 = vsyncpa [#allocation5], 0  ;;  %s2404_s0 = inlined_call_operand.vmem [shape: f32[2,8,32], index: 0, kind: input, shape index: {}]   ;;  %s2405_s1 = inlined_call_operand.vmem [shape: f32[32,128], index: 1, kind: input, shape index: {}]   ;;  %s2406_s2 = inlined_call_operand.hbm [shape: f32[32,128], index: 2, kind: input, shape index: {}]   ;;  %s2407_s3 = inlined_call_operand.vmem [shape: f32[1,128], index: 3, kind: input, shape index: {}]   ;;  %s2408_s4 = inlined_call_operand.vmem [shape: f32[32,16], index: 4, kind: input, shape index: {}]   ;;  %s2409_s5 = inlined_call_operand.vmem [shape: f32[1,16], index: 5, kind: input, shape index: {}]   ;;  %s2410_s6 = inlined_call_operand.hbm [shape: f32[2,16], index: 6, kind: output, shape index: {}]  }
   0x1   :  { %12 = vsyncpa [#allocation6], 0  ;;  %s2020_s21 = smov [#allocation4]  }
   0x2   :  { %s22_s22 = sshll.u32 %s2020_s21, 4  ;;  %s23_s22 = int_to_ptr.vmem [resolvable:$true] %s22_s22 }
   0x3   :  { %s1984_s23 = scalar_lea.vmem %s23_s22, 512  ;;  %p1989_p1 = scmp.lt.s32.totalorder %s23_s22, %s23_s22 }
   0x4   :  { %p1985_p0 = scmp.ne.s32.totalorder %s23_s22, %s1984_s23  ;;  %p1990_p2 = scmp.lt.s32.totalorder %s1984_s23, %s1984_s23 }
   0x6   :  { %p1991_p3 = por %p1990_p2, %p1989_p1 }
   0x8   :  { %p1992_p4 = pnand %p1991_p3, %p1985_p0 }
   0xa   :  { %1995 = shalt.err (!%p1992_p4)
}
   0xb   :  { %s2021_s24 = smov 128   ;;  %s2022_s25 = smov 8  }
   0xc   :  { %28 = dma.hbm_to_vmem [thread:$0]  %s2406_s2, 512, %s23_s22, [#allocation5], %s2021_s24, %s2021_s24, %s2022_s25  }
   0xd   :  { %2016 = dma.done.wait [#allocation5], 512  }
   0xe   :  { %2017 = vsyncadd [#allocation5], 4294966784  ;;  %vm42_vm0 = vcmask 254976   ;;  %v2023_v0 = vmov 0.0   ;;  %vm2024_vm1 = vmmov 0   ;;  %v2077_v1 = vld [vmem:[#allocation4 + $0x18] sm:$0xff] }
   0xf   :  { %1716 = vmatprep.subr.mxu0 %v2023_v0  ;;  %1727 = vmatprep.subr.mxu1 %v2023_v0  ;;  %43 = vst.msk [vmem:[#allocation2] sm:$0x3] %vm42_vm0, %v2023_v0  ;;  %44 = vst.msk [vmem:[#allocation3] sm:$0x3] %vm42_vm0, %v2023_v0  ;;  %v2082_v2 = vld [vmem:[%s2405_s1 + $0x18] sm:$0xff]  ;;  %v2091_v4 = vld [vmem:[%s2405_s1 + $0x10] sm:$0xff] }
  0x10   :  { %1724 = vmatprep.mubr.msk.f32.mxu0 %vm2024_vm1, %v2023_v0  ;;  %1735 = vmatprep.mubr.msk.f32.mxu1 %vm2024_vm1, %v2023_v0  ;;  %v2084_v3 = vld [vmem:[#allocation4 + $0x10] sm:$0xff]  ;;  %v2095_v5 = vld [vmem:[#allocation4 + $0x8] sm:$0xff]  ;;  %v62_v7 = vld [vmem:[%s2404_s0] sm:$0x1]  ;;  %vm141_vm2 = vcmask 1041409   ;;  %vm64_vm3 = vcmask 261120  }
  0x11   :  { %1717 = vmatpush3.msra.mxu0 %v2077_v1  ;;  %1728 = vmatpush3.msra.mxu1 %v2082_v2  ;;  %v2100_v6 = vld [vmem:[%s2405_s1 + $0x8] sm:$0xff]  ;;  %v2117_v10 = vld [vmem:[%s2405_s1] sm:$0xff]  ;;  %s2025_s16 = smov 64   ;;  %s2026_s17 = smov 32   ;;  %vm1587_vm4 = vcmask 123904  }
  0x12   :  { %1718 = vmatprep.subr.mxu0 %v2023_v0  ;;  %1729 = vmatprep.subr.mxu1 %v2023_v0  ;;  %v63_v8 = vld [vmem:[%s2404_s0 + $0x8] sm:$0x1]  ;;  %v2153_v15 = vld [vmem:[%s2407_s3] ss:$0 sm:$0xff]  ;;  %v244_v33 = vld [vmem:[%s2404_s0 + $0x1] sm:$0x1] }
  0x13   :  { %1719 = vmatpush3.msra.mxu0 %v2084_v3  ;;  %1730 = vmatpush3.msra.mxu1 %v2091_v4  ;;  %v2112_v9 = vld [vmem:[#allocation4] sm:$0xff]  ;;  %v140_v11 = vrot.slane %v63_v8, 7  ;;  %v422_v57 = vld [vmem:[%s2404_s0 + $0x2] sm:$0x1]  ;;  %s2027_s27 = smov 96   ;;  %s2028_s28 = smov [#allocation7]  }
  0x14   :  { %1720 = vmatprep.subr.mxu0 %v2023_v0  ;;  %1731 = vmatprep.subr.mxu1 %v2023_v0  ;;  %v245_v34 = vld [vmem:[%s2404_s0 + $0x9] sm:$0x1]  ;;  %v423_v58 = vld [vmem:[%s2404_s0 + $0xa] sm:$0x1] }
  0x15   :  { %1721 = vmatpush3.msra.mxu0 %v2095_v5  ;;  %1732 = vmatpush3.msra.mxu1 %v2100_v6  ;;  %v142_v13 = vsel %vm141_vm2, %v140_v11, %v62_v7  ;;  %v323_v35 = vrot.slane %v245_v34, 7  ;;  %v501_v59 = vrot.slane %v423_v58, 7 }
  0x16   :  { %v60_v12 = vld [vmem:[#allocation2] sm:$0x3]  ;;  %1722 = vmatprep.subr.mxu0 %v2023_v0  ;;  %1733 = vmatprep.subr.mxu1 %v2023_v0  ;;  %v61_v22 = vld [vmem:[#allocation3] sm:$0x3] }
  0x17   :  { %1723 = vmatpush3.msra.mxu0 %v2112_v9  ;;  %1734 = vmatpush3.msra.mxu1 %v2117_v10  ;;  %v324_v36 = vsel %vm141_vm2, %v323_v35, %v244_v33  ;;  %v502_v60 = vsel %vm141_vm2, %v501_v59, %v422_v57 }
  0x18   :  { %1725 = vmatmul.mubr.msk.f32.vlgmr.msra.gmra.mxu0 %vm64_vm3, %v60_v12  ;;  %1736 = vmatmul.mubr.msk.f32.vlgmr.msra.gmra.mxu1 %vm64_vm3, %v142_v13 }
  0x19   :  { %1749 = vmatprep.subr.mxu1 %v2023_v0  ;;  %1738 = vmatprep.subr.mxu0 %v2023_v0 }
  0x1a   :  { %1750 = vmatpush3.msra.mxu1 %v2082_v2  ;;  %1739 = vmatpush3.msra.mxu0 %v2077_v1 }
  0x1b   :  { %1751 = vmatprep.subr.mxu1 %v2023_v0  ;;  %1740 = vmatprep.subr.mxu0 %v2023_v0 }
  0x1c   :  { %1752 = vmatpush3.msra.mxu1 %v2091_v4  ;;  %1741 = vmatpush3.msra.mxu0 %v2084_v3 }
  0x1d   :  { %1753 = vmatprep.subr.mxu1 %v2023_v0  ;;  %1742 = vmatprep.subr.mxu0 %v2023_v0 }
  0x1e   :  { %1754 = vmatpush3.msra.mxu1 %v2100_v6  ;;  %1743 = vmatpush3.msra.mxu0 %v2095_v5 }
  0x1f   :  { %1755 = vmatprep.subr.mxu1 %v2023_v0  ;;  %1757 = vmatprep.mubr.msk.f32.mxu1 %vm2024_vm1, %v2023_v0 }
  0x20   :  { %1756 = vmatpush3.msra.mxu1 %v2117_v10  ;;  %1744 = vmatprep.subr.mxu0 %v2023_v0 }
  0x21   :  { %1745 = vmatpush3.msra.mxu0 %v2112_v9  ;;  %1746 = vmatprep.mubr.msk.f32.mxu0 %vm2024_vm1, %v2023_v0 }
  0x22   :  { %1771 = vmatprep.subr.mxu1 %v2023_v0  ;;  %1760 = vmatprep.subr.mxu0 %v2023_v0 }
  0x23   :  { %1758 = vmatmul.mubr.msk.f32.vlgmr.msra.gmra.mxu1 %vm64_vm3, %v324_v36 }
  0x24   :  { %1772 = vmatpush3.msra.mxu1 %v2082_v2  ;;  %1779 = vmatprep.mubr.msk.f32.mxu1 %vm2024_vm1, %v2023_v0 }
  0x25   :  { %1773 = vmatprep.subr.mxu1 %v2023_v0 }
  0x26   :  { %1774 = vmatpush3.msra.mxu1 %v2091_v4 }
  0x27   :  { %1775 = vmatprep.subr.mxu1 %v2023_v0 }
  0x28   :  { %1776 = vmatpush3.msra.mxu1 %v2100_v6 }
  0x29   :  { %1777 = vmatprep.subr.mxu1 %v2023_v0 }
  0x2a   :  { %1778 = vmatpush3.msra.mxu1 %v2117_v10 }
  0x2b   :  { %1793 = vmatprep.subr.mxu1 %v2023_v0  ;;  %1780 = vmatmul.mubr.msk.f32.vlgmr.msra.gmra.mxu1 %vm64_vm3, %v502_v60 }
  0x2c   :  { %1794 = vmatpush3.msra.mxu1 %v2082_v2  ;;  %1801 = vmatprep.mubr.msk.f32.mxu1 %vm2024_vm1, %v2023_v0 }
  0x2d   :  { %1795 = vmatprep.subr.mxu1 %v2023_v0 }
  0x2e   :  { %1796 = vmatpush3.msra.mxu1 %v2091_v4 }
  0x2f   :  { %1797 = vmatprep.subr.mxu1 %v2023_v0 }
  0x30   :  { %1798 = vmatpush3.msra.mxu1 %v2100_v6 }
  0x31   :  { %1799 = vmatprep.subr.mxu1 %v2023_v0 }
  0x32   :  { %1800 = vmatpush3.msra.mxu1 %v2117_v10 }
  0x33   :  { %1815 = vmatprep.subr.mxu1 %v2023_v0 }
  0xd8   :  { %v134_v14 = vpop.f32.mrf.mxu0  ;;  %v211_v16 = vpop.f32.mrf.mxu1 }
  0xd9   :  { %v212_v17 = vadd.f32 %v211_v16, %v134_v14 }
  0xda   :  { %v1726_v18 = vpop.f32.mrf.mxu0  ;;  %v1737_v19 = vpop.f32.mrf.mxu1 }
  0xdb   :  { %v215_v20 = vadd.f32 %v2153_v15, %v212_v17 }
  0xdd   :  { %1912 = vtanh.f32 %v215_v20  ;;  %v1607_v23 = vmul.f32 -1.442695, %v215_v20 }
  0xdf   :  { %1914 = vpow2.f32 %v1607_v23 }
  0xe3   :  { %v393_v40 = vpop.f32.mrf.mxu1 }
  0xe5   :  { %v1759_v41 = vpop.f32.mrf.mxu1 }
  0xea   :  { %v1913_v21 = vpop.eup %1912 }
  0xeb   :  { %229 = vrot.lane.b32.xlu0 %v1913_v21, %s2025_s16  ;;  %v571_v7 = vpop.f32.mrf.mxu1 }
  0xec   :  { %v1915_v24 = vpop.eup %1914 }
  0xed   :  { %v219_v25 = vadd.f32 1.0, %v1915_v24  ;;  %v1781_v8 = vpop.f32.mrf.mxu1 }
  0xef   :  { %224 = vrot.lane.b32.xlu0 %v61_v22, %s2026_s17  ;;  %1916 = vrcp.f32 %v219_v25 }
  0xfc   :  { %v1917_v26 = vpop.eup %1916 }
 0x15d   :  { %v230_v27 = vpop.permute.xlu0 %229 }
 0x15e   :  { %v232_v28 = vmul.f32 %v1917_v26, %v230_v27  ;;  %v600_v27 = vld [vmem:[%s2404_s0 + $0x3] sm:$0x1] }
 0x160   :  { %234 = vrot.lane.b32.xlu1 %v232_v28, %s2026_s17  ;;  %v601_v28 = vld [vmem:[%s2404_s0 + $0xb] sm:$0x1] }
 0x161   :  { %v225_v29 = vpop.permute.xlu0 %224 }
 0x162   :  { %v227_v30 = vmul.f32 %v1917_v26, %v225_v29  ;;  %v679_v29 = vrot.slane %v601_v28, 7 }
 0x1d2   :  { %v235_v31 = vpop.permute.xlu1 %234 }
 0x1d3   :  { %v237_v32 = vadd.f32 %v235_v31, %v227_v30  ;;  %v680_v30 = vsel %vm141_vm2, %v679_v29, %v600_v27 }
 0x1d4   :  { %1802 = vmatmul.mubr.msk.f32.vlgmr.msra.gmra.mxu1 %vm64_vm3, %v680_v30 }
 0x1d5   :  { %1918 = vtanh.f32 %v237_v32  ;;  %1816 = vmatpush3.msra.mxu1 %v2082_v2  ;;  %1823 = vmatprep.mubr.msk.f32.mxu1 %vm2024_vm1, %v2023_v0 }
 0x1d6   :  { %1817 = vmatprep.subr.mxu1 %v2023_v0 }
 0x1d7   :  { %1818 = vmatpush3.msra.mxu1 %v2091_v4 }
 0x1d8   :  { %1819 = vmatprep.subr.mxu1 %v2023_v0 }
 0x1d9   :  { %1820 = vmatpush3.msra.mxu1 %v2100_v6 }
 0x1da   :  { %1821 = vmatprep.subr.mxu1 %v2023_v0 }
 0x1db   :  { %1822 = vmatpush3.msra.mxu1 %v2117_v10 }
 0x1dc   :  { %1837 = vmatprep.subr.mxu1 %v2023_v0 }
 0x1e2   :  { %v1919_v37 = vpop.eup %1918 }
 0x1e3   :  { %240 = vrot.lane.b32.xlu1 %v1919_v37, %s2025_s16 }
 0x255   :  { %v241_v38 = vpop.permute.xlu1 %240 }
 0x256   :  { %v243_v39 = vmul.f32 %v1917_v26, %v241_v38 }
 0x258   :  { %247 = vrot.lane.b32.xlu0 %v243_v39, %s2026_s17 }
 0x294   :  { %v749_v34 = vpop.f32.mrf.mxu1 }
 0x296   :  { %v1803_v35 = vpop.f32.mrf.mxu1 }
 0x2ca   :  { %v248_v42 = vpop.permute.xlu0 %247 }
 0x2cb   :  { %1747 = vmatmul.mubr.msk.f32.vlgmr.msra.gmra.mxu0 %vm64_vm3, %v248_v42 }
 0x2cc   :  { %1761 = vmatpush3.msra.mxu0 %v2077_v1  ;;  %1768 = vmatprep.mubr.msk.f32.mxu0 %vm2024_vm1, %v2023_v0 }
 0x2cd   :  { %1762 = vmatprep.subr.mxu0 %v2023_v0 }
 0x2ce   :  { %1763 = vmatpush3.msra.mxu0 %v2084_v3 }
 0x2cf   :  { %1764 = vmatprep.subr.mxu0 %v2023_v0 }
 0x2d0   :  { %1765 = vmatpush3.msra.mxu0 %v2095_v5 }
 0x2d1   :  { %1766 = vmatprep.subr.mxu0 %v2023_v0 }
 0x2d2   :  { %1767 = vmatpush3.msra.mxu0 %v2112_v9 }
 0x2d3   :  { %1782 = vmatprep.subr.mxu0 %v2023_v0 }
 0x38b   :  { %v317_v43 = vpop.f32.mrf.mxu0 }
 0x38c   :  { %v394_v44 = vadd.f32 %v393_v40, %v317_v43 }
 0x38d   :  { %v1748_v45 = vpop.f32.mrf.mxu0 }
 0x38e   :  { %v397_v46 = vadd.f32 %v2153_v15, %v394_v44 }
 0x390   :  { %1920 = vtanh.f32 %v397_v46  ;;  %v1610_v48 = vmul.f32 -1.442695, %v397_v46 }
 0x392   :  { %1922 = vpow2.f32 %v1610_v48 }
 0x39d   :  { %v1921_v47 = vpop.eup %1920 }
 0x39e   :  { %407 = vrot.lane.b32.xlu1 %v1921_v47, %s2025_s16 }
 0x39f   :  { %v1923_v49 = vpop.eup %1922 }
 0x3a0   :  { %v401_v50 = vadd.f32 1.0, %v1923_v49 }
 0x3a2   :  { %1924 = vrcp.f32 %v401_v50 }
 0x3af   :  { %v1925_v51 = vpop.eup %1924 }
 0x3b0   :  { %v405_v54 = vmul.f32 %v1925_v51, %v237_v32 }
 0x410   :  { %v408_v52 = vpop.permute.xlu1 %407 }
 0x411   :  { %v410_v53 = vmul.f32 %v1925_v51, %v408_v52  ;;  %v779_v52 = vld [vmem:[%s2404_s0 + $0xc] sm:$0x1] }
 0x413   :  { %412 = vrot.lane.b32.xlu0 %v410_v53, %s2026_s17  ;;  %v857_v53 = vrot.slane %v779_v52, 7 }
 0x485   :  { %v413_v55 = vpop.permute.xlu0 %412 }
 0x486   :  { %v415_v56 = vadd.f32 %v413_v55, %v405_v54 }
 0x488   :  { %1926 = vtanh.f32 %v415_v56 }
 0x495   :  { %v1927_v61 = vpop.eup %1926 }
 0x496   :  { %418 = vrot.lane.b32.xlu1 %v1927_v61, %s2025_s16 }
 0x508   :  { %v419_v62 = vpop.permute.xlu1 %418 }
 0x509   :  { %v421_v63 = vmul.f32 %v1925_v51, %v419_v62  ;;  %v778_v51 = vld [vmem:[%s2404_s0 + $0x4] sm:$0x1] }
 0x50a   :  { %v858_v54 = vsel %vm141_vm2, %v857_v53, %v778_v51 }
 0x50b   :  { %425 = vrot.lane.b32.xlu0 %v421_v63, %s2026_s17  ;;  %1824 = vmatmul.mubr.msk.f32.vlgmr.msra.gmra.mxu1 %vm64_vm3, %v858_v54 }
 0x50c   :  { %1838 = vmatpush3.msra.mxu1 %v2082_v2  ;;  %1845 = vmatprep.mubr.msk.f32.mxu1 %vm2024_vm1, %v2023_v0 }
 0x50d   :  { %1839 = vmatprep.subr.mxu1 %v2023_v0 }
 0x50e   :  { %1840 = vmatpush3.msra.mxu1 %v2091_v4 }
 0x50f   :  { %1841 = vmatprep.subr.mxu1 %v2023_v0 }
 0x510   :  { %1842 = vmatpush3.msra.mxu1 %v2100_v6 }
 0x511   :  { %1843 = vmatprep.subr.mxu1 %v2023_v0 }
 0x512   :  { %1844 = vmatpush3.msra.mxu1 %v2117_v10 }
 0x513   :  { %1859 = vmatprep.subr.mxu1 %v2023_v0 }
 0x57d   :  { %v426_v11 = vpop.permute.xlu0 %425 }
 0x57e   :  { %1769 = vmatmul.mubr.msk.f32.vlgmr.msra.gmra.mxu0 %vm64_vm3, %v426_v11 }
 0x57f   :  { %1783 = vmatpush3.msra.mxu0 %v2077_v1  ;;  %1790 = vmatprep.mubr.msk.f32.mxu0 %vm2024_vm1, %v2023_v0 }
 0x580   :  { %1784 = vmatprep.subr.mxu0 %v2023_v0 }
 0x581   :  { %1785 = vmatpush3.msra.mxu0 %v2084_v3 }
 0x582   :  { %1786 = vmatprep.subr.mxu0 %v2023_v0 }
 0x583   :  { %1787 = vmatpush3.msra.mxu0 %v2095_v5 }
 0x584   :  { %1788 = vmatprep.subr.mxu0 %v2023_v0 }
 0x585   :  { %1789 = vmatpush3.msra.mxu0 %v2112_v9 }
 0x586   :  { %1804 = vmatprep.subr.mxu0 %v2023_v0 }
 0x5cb   :  { %v927_v58 = vpop.f32.mrf.mxu1 }
 0x5cd   :  { %v1825_v59 = vpop.f32.mrf.mxu1 }
 0x63e   :  { %v495_v12 = vpop.f32.mrf.mxu0 }
 0x63f   :  { %v572_v13 = vadd.f32 %v571_v7, %v495_v12 }
 0x640   :  { %v1770_v14 = vpop.f32.mrf.mxu0 }
 0x641   :  { %v575_v16 = vadd.f32 %v2153_v15, %v572_v13 }
 0x643   :  { %1928 = vtanh.f32 %v575_v16  ;;  %v1613_v18 = vmul.f32 -1.442695, %v575_v16 }
 0x645   :  { %1930 = vpow2.f32 %v1613_v18 }
 0x650   :  { %v1929_v17 = vpop.eup %1928 }
 0x651   :  { %585 = vrot.lane.b32.xlu1 %v1929_v17, %s2025_s16 }
 0x652   :  { %v1931_v19 = vpop.eup %1930 }
 0x653   :  { %v579_v20 = vadd.f32 1.0, %v1931_v19 }
 0x655   :  { %1932 = vrcp.f32 %v579_v20 }
 0x662   :  { %v1933_v21 = vpop.eup %1932 }
 0x663   :  { %v583_v24 = vmul.f32 %v1933_v21, %v415_v56 }
 0x6c3   :  { %v586_v22 = vpop.permute.xlu1 %585 }
 0x6c4   :  { %v588_v23 = vmul.f32 %v1933_v21, %v586_v22  ;;  %v957_v22 = vld [vmem:[%s2404_s0 + $0xd] sm:$0x1] }
 0x6c6   :  { %590 = vrot.lane.b32.xlu0 %v588_v23, %s2026_s17  ;;  %v1035_v23 = vrot.slane %v957_v22, 7 }
 0x738   :  { %v591_v25 = vpop.permute.xlu0 %590 }
 0x739   :  { %v593_v26 = vadd.f32 %v591_v25, %v583_v24 }
 0x73b   :  { %1934 = vtanh.f32 %v593_v26 }
 0x748   :  { %v1935_v31 = vpop.eup %1934 }
 0x749   :  { %596 = vrot.lane.b32.xlu1 %v1935_v31, %s2025_s16 }
 0x7bb   :  { %v597_v32 = vpop.permute.xlu1 %596 }
 0x7bc   :  { %v599_v33 = vmul.f32 %v1933_v21, %v597_v32  ;;  %v956_v21 = vld [vmem:[%s2404_s0 + $0x5] sm:$0x1] }
 0x7bd   :  { %v1036_v24 = vsel %vm141_vm2, %v1035_v23, %v956_v21 }
 0x7be   :  { %603 = vrot.lane.b32.xlu0 %v599_v33, %s2026_s17  ;;  %1846 = vmatmul.mubr.msk.f32.vlgmr.msra.gmra.mxu1 %vm64_vm3, %v1036_v24 }
 0x7bf   :  { %1860 = vmatpush3.msra.mxu1 %v2082_v2  ;;  %1867 = vmatprep.mubr.msk.f32.mxu1 %vm2024_vm1, %v2023_v0 }
 0x7c0   :  { %1861 = vmatprep.subr.mxu1 %v2023_v0 }
 0x7c1   :  { %1862 = vmatpush3.msra.mxu1 %v2091_v4 }
 0x7c2   :  { %1863 = vmatprep.subr.mxu1 %v2023_v0 }
 0x7c3   :  { %1864 = vmatpush3.msra.mxu1 %v2100_v6 }
 0x7c4   :  { %1865 = vmatprep.subr.mxu1 %v2023_v0 }
 0x7c5   :  { %1866 = vmatpush3.msra.mxu1 %v2117_v10 }
 0x7c6   :  { %1881 = vmatprep.subr.mxu1 %v2023_v0 }
 0x830   :  { %v604_v36 = vpop.permute.xlu0 %603 }
 0x831   :  { %1791 = vmatmul.mubr.msk.f32.vlgmr.msra.gmra.mxu0 %vm64_vm3, %v604_v36 }
 0x832   :  { %1805 = vmatpush3.msra.mxu0 %v2077_v1  ;;  %1812 = vmatprep.mubr.msk.f32.mxu0 %vm2024_vm1, %v2023_v0 }
 0x833   :  { %1806 = vmatprep.subr.mxu0 %v2023_v0 }
 0x834   :  { %1807 = vmatpush3.msra.mxu0 %v2084_v3 }
 0x835   :  { %1808 = vmatprep.subr.mxu0 %v2023_v0 }
 0x836   :  { %1809 = vmatpush3.msra.mxu0 %v2095_v5 }
 0x837   :  { %1810 = vmatprep.subr.mxu0 %v2023_v0 }
 0x838   :  { %1811 = vmatpush3.msra.mxu0 %v2112_v9 }
 0x839   :  { %1826 = vmatprep.subr.mxu0 %v2023_v0 }
 0x87e   :  { %v1105_v28 = vpop.f32.mrf.mxu1 }
 0x880   :  { %v1847_v29 = vpop.f32.mrf.mxu1 }
 0x8f1   :  { %v673_v37 = vpop.f32.mrf.mxu0 }
 0x8f2   :  { %v750_v38 = vadd.f32 %v749_v34, %v673_v37 }
 0x8f3   :  { %v1792_v39 = vpop.f32.mrf.mxu0 }
 0x8f4   :  { %v753_v40 = vadd.f32 %v2153_v15, %v750_v38 }
 0x8f6   :  { %1936 = vtanh.f32 %v753_v40  ;;  %v1616_v42 = vmul.f32 -1.442695, %v753_v40 }
 0x8f8   :  { %1938 = vpow2.f32 %v1616_v42 }
 0x903   :  { %v1937_v41 = vpop.eup %1936 }
 0x904   :  { %763 = vrot.lane.b32.xlu1 %v1937_v41, %s2025_s16 }
 0x905   :  { %v1939_v43 = vpop.eup %1938 }
 0x906   :  { %v757_v44 = vadd.f32 1.0, %v1939_v43 }
 0x908   :  { %1940 = vrcp.f32 %v757_v44 }
 0x915   :  { %v1941_v45 = vpop.eup %1940 }
 0x916   :  { %v761_v48 = vmul.f32 %v1941_v45, %v593_v26 }
 0x976   :  { %v764_v46 = vpop.permute.xlu1 %763 }
 0x977   :  { %v766_v47 = vmul.f32 %v1941_v45, %v764_v46  ;;  %v1135_v46 = vld [vmem:[%s2404_s0 + $0xe] sm:$0x1] }
 0x979   :  { %768 = vrot.lane.b32.xlu0 %v766_v47, %s2026_s17  ;;  %v1213_v47 = vrot.slane %v1135_v46, 7 }
 0x9eb   :  { %v769_v49 = vpop.permute.xlu0 %768 }
 0x9ec   :  { %v771_v50 = vadd.f32 %v769_v49, %v761_v48 }
 0x9ee   :  { %1942 = vtanh.f32 %v771_v50 }
 0x9fb   :  { %v1943_v55 = vpop.eup %1942 }
 0x9fc   :  { %774 = vrot.lane.b32.xlu1 %v1943_v55, %s2025_s16 }
 0xa6e   :  { %v775_v56 = vpop.permute.xlu1 %774 }
 0xa6f   :  { %v777_v57 = vmul.f32 %v1941_v45, %v775_v56  ;;  %v1134_v45 = vld [vmem:[%s2404_s0 + $0x6] sm:$0x1] }
 0xa70   :  { %v1214_v48 = vsel %vm141_vm2, %v1213_v47, %v1134_v45 }
 0xa71   :  { %781 = vrot.lane.b32.xlu0 %v777_v57, %s2026_s17  ;;  %1868 = vmatmul.mubr.msk.f32.vlgmr.msra.gmra.mxu1 %vm64_vm3, %v1214_v48 }
 0xa72   :  { %1882 = vmatpush3.msra.mxu1 %v2082_v2  ;;  %1889 = vmatprep.mubr.msk.f32.mxu1 %vm2024_vm1, %v2023_v0 }
 0xa73   :  { %1883 = vmatprep.subr.mxu1 %v2023_v0 }
 0xa74   :  { %1884 = vmatpush3.msra.mxu1 %v2091_v4 }
 0xa75   :  { %1885 = vmatprep.subr.mxu1 %v2023_v0 }
 0xa76   :  { %1886 = vmatpush3.msra.mxu1 %v2100_v6 }
 0xa77   :  { %1887 = vmatprep.subr.mxu1 %v2023_v0 }
 0xa78   :  { %1888 = vmatpush3.msra.mxu1 %v2117_v10 }
 0xae3   :  { %v782_v60 = vpop.permute.xlu0 %781 }
 0xae4   :  { %1813 = vmatmul.mubr.msk.f32.vlgmr.msra.gmra.mxu0 %vm64_vm3, %v782_v60 }
 0xae5   :  { %1827 = vmatpush3.msra.mxu0 %v2077_v1  ;;  %1834 = vmatprep.mubr.msk.f32.mxu0 %vm2024_vm1, %v2023_v0 }
 0xae6   :  { %1828 = vmatprep.subr.mxu0 %v2023_v0 }
 0xae7   :  { %1829 = vmatpush3.msra.mxu0 %v2084_v3 }
 0xae8   :  { %1830 = vmatprep.subr.mxu0 %v2023_v0 }
 0xae9   :  { %1831 = vmatpush3.msra.mxu0 %v2095_v5 }
 0xaea   :  { %1832 = vmatprep.subr.mxu0 %v2023_v0 }
 0xaeb   :  { %1833 = vmatpush3.msra.mxu0 %v2112_v9 }
 0xaec   :  { %1848 = vmatprep.subr.mxu0 %v2023_v0 }
 0xb31   :  { %v1283_v51 = vpop.f32.mrf.mxu1 }
 0xb33   :  { %v1869_v52 = vpop.f32.mrf.mxu1 }
 0xba4   :  { %v851_v61 = vpop.f32.mrf.mxu0 }
 0xba5   :  { %v928_v62 = vadd.f32 %v927_v58, %v851_v61  ;;  %v1312_v61 = vld [vmem:[%s2404_s0 + $0x7] sm:$0x1] }
 0xba6   :  { %v1814_v63 = vpop.f32.mrf.mxu0 }
 0xba7   :  { %v931_v7 = vadd.f32 %v2153_v15, %v928_v62  ;;  %v1313_v62 = vld [vmem:[%s2404_s0 + $0xf] sm:$0x1] }
 0xba8   :  { %v1391_v63 = vrot.slane %v1313_v62, 7 }
 0xba9   :  { %1944 = vtanh.f32 %v931_v7  ;;  %v1619_v11 = vmul.f32 -1.442695, %v931_v7 }
 0xbaa   :  { %v1392_v7 = vsel %vm141_vm2, %v1391_v63, %v1312_v61 }
 0xbab   :  { %1946 = vpow2.f32 %v1619_v11  ;;  %1890 = vmatmul.mubr.msk.f32.vlgmr.msra.gmra.mxu1 %vm64_vm3, %v1392_v7 }
 0xbb6   :  { %v1945_v8 = vpop.eup %1944 }
 0xbb7   :  { %941 = vrot.lane.b32.xlu1 %v1945_v8, %s2025_s16 }
 0xbb8   :  { %v1947_v12 = vpop.eup %1946 }
 0xbb9   :  { %v935_v13 = vadd.f32 1.0, %v1947_v12 }
 0xbbb   :  { %1948 = vrcp.f32 %v935_v13 }
 0xbc8   :  { %v1949_v14 = vpop.eup %1948 }
 0xbc9   :  { %v939_v18 = vmul.f32 %v1949_v14, %v771_v50 }
 0xc29   :  { %v942_v16 = vpop.permute.xlu1 %941 }
 0xc2a   :  { %v944_v17 = vmul.f32 %v1949_v14, %v942_v16 }
 0xc2c   :  { %946 = vrot.lane.b32.xlu0 %v944_v17, %s2026_s17 }
 0xc6b   :  { %v1461_v13 = vpop.f32.mrf.mxu1 }
 0xc9e   :  { %v947_v19 = vpop.permute.xlu0 %946 }
 0xc9f   :  { %v949_v20 = vadd.f32 %v947_v19, %v939_v18 }
 0xca1   :  { %1950 = vtanh.f32 %v949_v20 }
 0xcae   :  { %v1951_v25 = vpop.eup %1950 }
 0xcaf   :  { %952 = vrot.lane.b32.xlu1 %v1951_v25, %s2025_s16 }
 0xd21   :  { %v953_v26 = vpop.permute.xlu1 %952 }
 0xd22   :  { %v955_v27 = vmul.f32 %v1949_v14, %v953_v26  ;;  %v1891_v14 = vpop.f32.mrf.mxu1 }
 0xd24   :  { %959 = vrot.lane.b32.xlu0 %v955_v27, %s2026_s17 }
 0xd96   :  { %v960_v30 = vpop.permute.xlu0 %959 }
 0xd97   :  { %1835 = vmatmul.mubr.msk.f32.vlgmr.msra.gmra.mxu0 %vm64_vm3, %v960_v30 }
 0xd98   :  { %1849 = vmatpush3.msra.mxu0 %v2077_v1  ;;  %1856 = vmatprep.mubr.msk.f32.mxu0 %vm2024_vm1, %v2023_v0 }
 0xd99   :  { %1850 = vmatprep.subr.mxu0 %v2023_v0 }
 0xd9a   :  { %1851 = vmatpush3.msra.mxu0 %v2084_v3 }
 0xd9b   :  { %1852 = vmatprep.subr.mxu0 %v2023_v0 }
 0xd9c   :  { %1853 = vmatpush3.msra.mxu0 %v2095_v5 }
 0xd9d   :  { %1854 = vmatprep.subr.mxu0 %v2023_v0 }
 0xd9e   :  { %1855 = vmatpush3.msra.mxu0 %v2112_v9 }
 0xd9f   :  { %1870 = vmatprep.subr.mxu0 %v2023_v0 }
 0xe57   :  { %v1029_v31 = vpop.f32.mrf.mxu0 }
 0xe58   :  { %v1106_v32 = vadd.f32 %v1105_v28, %v1029_v31  ;;  %v1506_v31 = vld [vmem:[%s2408_s4 + $0x10] sm:$0xff] }
 0xe59   :  { %v1836_v33 = vpop.f32.mrf.mxu0 }
 0xe5a   :  { %v1109_v34 = vadd.f32 %v2153_v15, %v1106_v32  ;;  %v1505_v32 = vld [vmem:[%s2408_s4 + $0x8] sm:$0xff]  ;;  %v1504_v33 = vld [vmem:[%s2408_s4] sm:$0xff] }
 0xe5c   :  { %1952 = vtanh.f32 %v1109_v34  ;;  %v1622_v36 = vmul.f32 -1.442695, %v1109_v34 }
 0xe5e   :  { %1954 = vpow2.f32 %v1622_v36 }
 0xe69   :  { %v1953_v35 = vpop.eup %1952 }
 0xe6a   :  { %1119 = vrot.lane.b32.xlu1 %v1953_v35, %s2025_s16 }
 0xe6b   :  { %v1955_v37 = vpop.eup %1954 }
 0xe6c   :  { %v1113_v38 = vadd.f32 1.0, %v1955_v37 }
 0xe6e   :  { %1956 = vrcp.f32 %v1113_v38 }
 0xe7b   :  { %v1957_v39 = vpop.eup %1956 }
 0xe7c   :  { %v1117_v42 = vmul.f32 %v1957_v39, %v949_v20 }
 0xedc   :  { %v1120_v40 = vpop.permute.xlu1 %1119 }
 0xedd   :  { %v1122_v41 = vmul.f32 %v1957_v39, %v1120_v40 }
 0xedf   :  { %1124 = vrot.lane.b32.xlu0 %v1122_v41, %s2026_s17 }
 0xf51   :  { %v1125_v43 = vpop.permute.xlu0 %1124 }
 0xf52   :  { %v1127_v44 = vadd.f32 %v1125_v43, %v1117_v42 }
 0xf54   :  { %1958 = vtanh.f32 %v1127_v44 }
 0xf61   :  { %v1959_v49 = vpop.eup %1958 }
 0xf62   :  { %1130 = vrot.lane.b32.xlu1 %v1959_v49, %s2025_s16 }
 0xfd4   :  { %v1131_v50 = vpop.permute.xlu1 %1130 }
 0xfd5   :  { %v1133_v2 = vmul.f32 %v1957_v39, %v1131_v50 }
 0xfd7   :  { %1137 = vrot.lane.b32.xlu0 %v1133_v2, %s2026_s17 }
0x1049   :  { %v1138_v53 = vpop.permute.xlu0 %1137 }
0x104a   :  { %1857 = vmatmul.mubr.msk.f32.vlgmr.msra.gmra.mxu0 %vm64_vm3, %v1138_v53 }
0x104b   :  { %1871 = vmatpush3.msra.mxu0 %v2077_v1  ;;  %1878 = vmatprep.mubr.msk.f32.mxu0 %vm2024_vm1, %v2023_v0 }
0x104c   :  { %1872 = vmatprep.subr.mxu0 %v2023_v0 }
0x104d   :  { %1873 = vmatpush3.msra.mxu0 %v2084_v3 }
0x104e   :  { %1874 = vmatprep.subr.mxu0 %v2023_v0 }
0x104f   :  { %1875 = vmatpush3.msra.mxu0 %v2095_v5 }
0x1050   :  { %1876 = vmatprep.subr.mxu0 %v2023_v0 }
0x1051   :  { %1877 = vmatpush3.msra.mxu0 %v2112_v9 }
0x1052   :  { %1892 = vmatprep.subr.mxu0 %v2023_v0 }
0x110a   :  { %v1207_v4 = vpop.f32.mrf.mxu0 }
0x110b   :  { %v1284_v6 = vadd.f32 %v1283_v51, %v1207_v4 }
0x110c   :  { %v1858_v1 = vpop.f32.mrf.mxu0 }
0x110d   :  { %v1287_v10 = vadd.f32 %v2153_v15, %v1284_v6 }
0x110f   :  { %1960 = vtanh.f32 %v1287_v10  ;;  %v1625_v3 = vmul.f32 -1.442695, %v1287_v10 }
0x1111   :  { %1962 = vpow2.f32 %v1625_v3 }
0x111c   :  { %v1961_v54 = vpop.eup %1960 }
0x111d   :  { %1297 = vrot.lane.b32.xlu1 %v1961_v54, %s2025_s16 }
0x111e   :  { %v1963_v55 = vpop.eup %1962 }
0x111f   :  { %v1291_v56 = vadd.f32 1.0, %v1963_v55 }
0x1121   :  { %1964 = vrcp.f32 %v1291_v56 }
0x112e   :  { %v1965_v5 = vpop.eup %1964 }
0x112f   :  { %v1295_v9 = vmul.f32 %v1965_v5, %v1127_v44 }
0x118f   :  { %v1298_v57 = vpop.permute.xlu1 %1297 }
0x1190   :  { %v1300_v58 = vmul.f32 %v1965_v5, %v1298_v57 }
0x1192   :  { %1302 = vrot.lane.b32.xlu0 %v1300_v58, %s2026_s17 }
0x1204   :  { %v1303_v59 = vpop.permute.xlu0 %1302 }
0x1205   :  { %v1305_v60 = vadd.f32 %v1303_v59, %v1295_v9 }
0x1207   :  { %1966 = vtanh.f32 %v1305_v60 }
0x1214   :  { %v1967_v8 = vpop.eup %1966 }
0x1215   :  { %1308 = vrot.lane.b32.xlu1 %v1967_v8, %s2025_s16 }
0x1287   :  { %v1309_v11 = vpop.permute.xlu1 %1308 }
0x1288   :  { %v1311_v12 = vmul.f32 %v1965_v5, %v1309_v11 }
0x128a   :  { %1315 = vrot.lane.b32.xlu0 %v1311_v12, %s2026_s17 }
0x12fc   :  { %v1316_v16 = vpop.permute.xlu0 %1315 }
0x12fd   :  { %1879 = vmatmul.mubr.msk.f32.vlgmr.msra.gmra.mxu0 %vm64_vm3, %v1316_v16 }
0x12fe   :  { %1900 = vmatprep.mubr.msk.f32.mxu0 %vm2024_vm1, %v2023_v0 }
0x13bd   :  { %v1385_v17 = vpop.f32.mrf.mxu0 }
0x13be   :  { %v1462_v18 = vadd.f32 %v1461_v13, %v1385_v17 }
0x13bf   :  { %v1880_v19 = vpop.f32.mrf.mxu0 }
0x13c0   :  { %v1465_v20 = vadd.f32 %v2153_v15, %v1462_v18  ;;  %v1507_v15 = vld [vmem:[%s2408_s4 + $0x18] sm:$0xff] }
0x13c1   :  { %1893 = vmatpush3.msra.mxu0 %v1507_v15 }
0x13c2   :  { %1968 = vtanh.f32 %v1465_v20  ;;  %v1628_v22 = vmul.f32 -1.442695, %v1465_v20  ;;  %1894 = vmatprep.subr.mxu0 %v2023_v0 }
0x13c3   :  { %1895 = vmatpush3.msra.mxu0 %v1506_v31 }
0x13c4   :  { %1970 = vpow2.f32 %v1628_v22  ;;  %1896 = vmatprep.subr.mxu0 %v2023_v0 }
0x13c5   :  { %1897 = vmatpush3.msra.mxu0 %v1505_v32 }
0x13c6   :  { %1898 = vmatprep.subr.mxu0 %v2023_v0  ;;  %v1629_v0 = vld [vmem:[%s2409_s5] ss:$0 sm:$0xff] }
0x13c7   :  { %1899 = vmatpush3.msra.mxu0 %v1504_v33 }
0x13cf   :  { %v1969_v21 = vpop.eup %1968 }
0x13d0   :  { %1475 = vrot.lane.b32.xlu1 %v1969_v21, %s2025_s16 }
0x13d1   :  { %v1971_v23 = vpop.eup %1970 }
0x13d2   :  { %v1469_v24 = vadd.f32 1.0, %v1971_v23 }
0x13d4   :  { %1972 = vrcp.f32 %v1469_v24 }
0x13e1   :  { %v1973_v25 = vpop.eup %1972 }
0x13e2   :  { %v1473_v28 = vmul.f32 %v1973_v25, %v1305_v60 }
0x1442   :  { %v1476_v26 = vpop.permute.xlu1 %1475 }
0x1443   :  { %v1478_v27 = vmul.f32 %v1973_v25, %v1476_v26 }
0x1445   :  { %1480 = vrot.lane.b32.xlu0 %v1478_v27, %s2026_s17 }
0x14b7   :  { %v1481_v29 = vpop.permute.xlu0 %1480 }
0x14b8   :  { %v1483_v30 = vadd.f32 %v1481_v29, %v1473_v28 }
0x14ba   :  { %1974 = vtanh.f32 %v1483_v30 }
0x14c7   :  { %v1975_v34 = vpop.eup %1974 }
0x14c8   :  { %1486 = vrot.lane.b32.xlu1 %v1975_v34, %s2025_s16  ;;  %s1595_s16 = sshll.u32 %s2028_s28, 4  ;;  %s1596_s16 = int_to_ptr.vmem [resolvable:$true] %s1595_s16 }
0x14c9   :  { %p2001_p6 = scmp.lt.s32.totalorder %s1596_s16, %s1596_s16 }
0x14cc   :  { %1497 = vrot.lane.b32.xlu1 %v1483_v30, %s2027_s27 }
0x153a   :  { %v1487_v35 = vpop.permute.xlu1 %1486 }
0x153b   :  { %v1489_v36 = vmul.f32 %v1973_v25, %v1487_v35 }
0x153d   :  { %1491 = vrot.lane.b32.xlu0 %v1489_v36, %s2026_s17  ;;  %s1996_s17 = scalar_lea.vmem %s1596_s16, 32 }
0x153e   :  { %v1498_v37 = vpop.permute.xlu1 %1497  ;;  %p1997_p5 = scmp.ne.s32.totalorder %s1596_s16, %s1996_s17  ;;  %p2002_p7 = scmp.lt.s32.totalorder %s1996_s17, %s1996_s17 }
0x153f   :  { %1500 = vst.msk [vmem:[#allocation3] sm:$0x3] %vm42_vm0, %v1498_v37 }
0x1540   :  { %p2003_p8 = por %p2002_p7, %p2001_p6 }
0x1542   :  { %p2004_p9 = pnand %p2003_p8, %p1997_p5 }
0x15af   :  { %v1492_v38 = vpop.permute.xlu0 %1491 }
0x15b0   :  { %1495 = vst.msk [vmem:[#allocation2] sm:$0x3] %vm42_vm0, %v1492_v38  ;;  %1901 = vmatmul.mubr.msk.f32.vlgmr.msra.gmra.mxu0 %vm64_vm3, %v1492_v38 }
0x1670   :  { %v1583_v39 = vpop.f32.mrf.mxu0 }
0x1671   :  { %v1584_v40 = vadd.f32 %v1629_v0, %v1583_v39 }
0x1672   :  { %v1902_v41 = vpop.f32.mrf.mxu0 }
0x1673   :  { %1588 = vst.msk [vmem:[#allocation7] sm:$0x3] %vm1587_vm4, %v1584_v40 }
0x1674   :  { %2007 = shalt.err (!%p2004_p9)
}
0x1675   :  { %1598 = dma.vmem_to_hbm [thread:$0]  %s1596_s16, 32, %s2410_s6, [#allocation6]  }
0x1676   :  { %2018 = dma.done.wait [#allocation6], 32  }
0x1677   :  { %2019 = vsyncadd [#allocation6], 4294967264 }
0x1678   :  { %1602 = vsyncpa [#allocation5], 1 }
0x1679   :  { %1603 = vsyncpa [#allocation6], 1 }

</bundles_post_ra>
